<compile_context>
chip_gen: v5e
topology: v5e:2x2
jax: 0.10.0
libtpu: 0.0.40
codegen_flags: <defaults>
</compile_context>

<pallas_src>
import functools
import math

import jax
import jax.numpy as jnp
from jax.experimental import pallas as pl
from jax.experimental.pallas import tpu as pltpu

LANES = 128


def _round_up(x, m):
    return ((x + m - 1) // m) * m


def _device_kind():
    try:
        return jax.devices()[0].device_kind.lower()
    except Exception:
        return ""


def _default_tile_and_vmem():
    """Generation-aware (max tile rows, scoped-VMEM limit in bytes)."""
    kind = _device_kind()
    mib = 1024 * 1024
    if "v7" in kind or "tpu7" in kind:
        return 2048, 56 * mib          # 64 MiB physical VMEM per TensorCore
    if "v6" in kind:
        return 2048, 64 * mib          # 128 MiB physical
    if "v5" in kind or "v4" in kind:
        return 1024, 64 * mib          # 128 MiB physical
    return 512, None                   # unknown: stay inside scoped default


def _make_iou_kernel(loc_loss_type, has_weight, n_boxes, tile_rows):
    """Kernel over one (4, tile_rows, 128) block of pred/target boxes."""

    def compute(pred_ref, tgt_ref, w_ref, flag_ref, out_ref):
        f32 = jnp.float32
        pred_left = pred_ref[0].astype(f32)
        pred_top = pred_ref[1].astype(f32)
        pred_right = pred_ref[2].astype(f32)
        pred_bottom = pred_ref[3].astype(f32)
        target_left = tgt_ref[0].astype(f32)
        target_top = tgt_ref[1].astype(f32)
        target_right = tgt_ref[2].astype(f32)
        target_bottom = tgt_ref[3].astype(f32)

        target_area = (target_left + target_right) * (target_top + target_bottom)
        pred_area = (pred_left + pred_right) * (pred_top + pred_bottom)

        w_intersect = (jnp.minimum(pred_left, target_left)
                       + jnp.minimum(pred_right, target_right))
        h_intersect = (jnp.minimum(pred_bottom, target_bottom)
                       + jnp.minimum(pred_top, target_top))
        g_w_intersect = (jnp.maximum(pred_left, target_left)
                         + jnp.maximum(pred_right, target_right))
        g_h_intersect = (jnp.maximum(pred_bottom, target_bottom)
                         + jnp.maximum(pred_top, target_top))

        area_intersect = w_intersect * h_intersect
        area_union = target_area + pred_area - area_intersect
        ac_uion = g_w_intersect * g_h_intersect + 1e-7
        ious = (area_intersect + 1.0) / (area_union + 1.0)
        gious = ious - (ac_uion - area_union) / ac_uion

        if loc_loss_type in ("diou", "ciou"):
            target_center_x = (target_right - target_left) / 2
            target_center_y = (target_top - target_bottom) / 2
            pred_center_x = (pred_right - pred_left) / 2
            pred_center_y = (pred_top - pred_bottom) / 2
            inter_diag = ((target_center_x - pred_center_x) ** 2
                          + (target_center_y - pred_center_y) ** 2)
            outer_diag = g_w_intersect ** 2 + g_h_intersect ** 2
            u = inter_diag / outer_diag       # NaN for all-zero boxes, like torch
            dious = ious - u

        if loc_loss_type == "iou":
            losses = -jnp.log(ious)
        elif loc_loss_type == "liou":
            losses = 1.0 - ious
        elif loc_loss_type == "giou":
            losses = 1.0 - gious
        elif loc_loss_type == "diou":
            losses = 1.0 - dious
        elif loc_loss_type == "ciou":
            v = (4.0 / (math.pi ** 2)) * jnp.square(
                jnp.arctan((target_left + target_right)
                           / (target_top + target_bottom + 1e-7))
                - jnp.arctan((pred_left + pred_right)
                             / (pred_top + pred_bottom + 1e-7)))
            S = 1.0 - ious
            alpha = v / (S + v)
            cious = ious - (u + alpha * v)
            losses = 1.0 - cious
        else:
            raise NotImplementedError(loc_loss_type)

        if has_weight:
            w = w_ref[...].astype(f32)
            # torch semantics: weighted sum iff weight.sum() > 0, else plain sum.
            w = jnp.where(flag_ref[0] > 0, w, jnp.float32(1.0))
            losses = losses * w

        # Validity mask (select, not multiply -> NaN-safe for pad lanes).
        rows = jax.lax.broadcasted_iota(jnp.int32, (tile_rows, LANES), 0)
        lanes = jax.lax.broadcasted_iota(jnp.int32, (tile_rows, LANES), 1)
        box = (pl.program_id(0) * tile_rows + rows) * LANES + lanes
        contrib = jnp.where(box < n_boxes, losses, 0.0)

        # Pure-VPU fold of tile_rows sublane rows into one lane-dense (8, 128)
        # partial sum; no XLU cross-lane reduce, no scalar RMW.
        partial = contrib.reshape(tile_rows // 8, 8, LANES).sum(axis=0)
        out_ref[...] = partial.reshape(1, 8, LANES)

    if has_weight:
        def kernel(flag_ref, pred_ref, tgt_ref, w_ref, out_ref):
            compute(pred_ref, tgt_ref, w_ref, flag_ref, out_ref)
    else:
        def kernel(pred_ref, tgt_ref, out_ref):
            compute(pred_ref, tgt_ref, None, None, out_ref)
    return kernel


def _to_planar(x, name):
    """Canonicalize boxes to planar (4, R, 128). Returns (planar, inferred_n)."""
    if x.ndim == 3 and x.shape[0] == 4 and x.shape[-1] == LANES:
        return x, x.shape[1] * LANES                       # zero-copy fast path
    if x.ndim == 2 and x.shape[0] == 4:                    # planar (4, N)
        n = x.shape[1]
        r = pl.cdiv(n, LANES)
        pad = r * LANES - n
        if pad:
            x = jnp.pad(x, ((0, 0), (0, pad)))
        return x.reshape(4, r, LANES), n
    if x.ndim == 2 and x.shape[1] == 4:                    # module-native [N, 4]
        # TODO(synk): row-major [N, 4] needs a transpose repack (one extra HBM
        # pass); prefer feeding boxes in planar (4, N) / (4, R, 128) layout.
        n = x.shape[0]
        r = pl.cdiv(n, LANES)
        pad = r * LANES - n
        xp = jnp.pad(x, ((0, pad), (0, 0))) if pad else x
        return xp.T.reshape(4, r, LANES), n
    raise ValueError(f"{name}: expected (N,4), (4,N) or (4,R,128), got {x.shape}")


@functools.partial(jax.jit,
                   static_argnames=("loc_loss_type", "tile_rows", "num_boxes"))
def iou_loss(pred, target, weight=None, *, loc_loss_type="giou",
             tile_rows=None, num_boxes=None):
    """IOULoss forward (scalar sum), matching the PyTorch module.

    pred/target: boxes as (l, t, r, b) distances, in [N,4], (4,N) or
    (4,R,128) layout (planar preferred: avoids any repack copy).
    weight: optional [N]. num_boxes: number of valid boxes when a pre-padded
    planar layout is supplied.
    """
    pred_p, n_pred = _to_planar(pred, "pred")
    tgt_p, n_tgt = _to_planar(target, "target")
    assert pred_p.shape == tgt_p.shape, (pred_p.shape, tgt_p.shape)
    n = num_boxes if num_boxes is not None else min(n_pred, n_tgt)
    assert n > 0  # torch: assert losses.numel() != 0

    r = pred_p.shape[1]
    tile_max, vmem_limit = _default_tile_and_vmem()
    if tile_rows is not None:
        tile_max = tile_rows
    assert tile_max % 8 == 0 and tile_max >= 8
    # Cap the tile so the grid keeps ~4 steps (megacore + DMA/compute overlap),
    # sublane-aligned, while never exceeding the generation budget.
    tr = max(8, min(tile_max, _round_up(pl.cdiv(r, 4), 8)))
    grid = pl.cdiv(r, tr)
    r_pad = grid * tr
    if r_pad > r:  # pad contents are irrelevant: the in-kernel mask drops them
        pred_p = jnp.pad(pred_p, ((0, 0), (0, r_pad - r), (0, 0)))
        tgt_p = jnp.pad(tgt_p, ((0, 0), (0, r_pad - r), (0, 0)))

    box_spec = pl.BlockSpec((4, tr, LANES), lambda i, *_: (0, i, 0))
    out_spec = pl.BlockSpec((1, 8, LANES), lambda i, *_: (i, 0, 0))
    out_shape = jax.ShapeDtypeStruct((grid, 8, LANES), jnp.float32)

    cp_kwargs = dict(dimension_semantics=("parallel",))
    if vmem_limit is not None:
        cp_kwargs["vmem_limit_bytes"] = vmem_limit
    compiler_params = pltpu.CompilerParams(**cp_kwargs)

    kernel = _make_iou_kernel(loc_loss_type, weight is not None, n, tr)

    if weight is None:
        partials = pl.pallas_call(
            kernel,
            out_shape=out_shape,
            grid_spec=pltpu.PrefetchScalarGridSpec(
                num_scalar_prefetch=0,
                grid=(grid,),
                in_specs=[box_spec, box_spec],
                out_specs=out_spec),
            compiler_params=compiler_params,
        )(pred_p, tgt_p)
    else:
        w = weight.reshape(-1)
        flag = (jnp.sum(w.astype(jnp.float32)) > 0).astype(jnp.int32).reshape(1)
        w2d = jnp.pad(w, (0, r_pad * LANES - w.shape[0])).reshape(r_pad, LANES)
        w_spec = pl.BlockSpec((tr, LANES), lambda i, *_: (i, 0))
        partials = pl.pallas_call(
            kernel,
            out_shape=out_shape,
            grid_spec=pltpu.PrefetchScalarGridSpec(
                num_scalar_prefetch=1,
                grid=(grid,),
                in_specs=[box_spec, box_spec, w_spec],
                out_specs=out_spec),
            compiler_params=compiler_params,
        )(flag, pred_p, tgt_p, w2d)

    # Tiny final reduction over (grid, 8, 128) lane-dense partial sums.
    return jnp.sum(partials)


def iou_loss_ref(pred, target, weight=None, loc_loss_type="giou"):
    """Literal JAX translation of the PyTorch module (validation only)."""
    pl_, pt, pr, pb = pred[:, 0], pred[:, 1], pred[:, 2], pred[:, 3]
    tl, tt, tr, tb = target[:, 0], target[:, 1], target[:, 2], target[:, 3]
    target_area = (tl + tr) * (tt + tb)
    pred_area = (pl_ + pr) * (pt + pb)
    w_int = jnp.minimum(pl_, tl) + jnp.minimum(pr, tr)
    h_int = jnp.minimum(pb, tb) + jnp.minimum(pt, tt)
    g_w = jnp.maximum(pl_, tl) + jnp.maximum(pr, tr)
    g_h = jnp.maximum(pb, tb) + jnp.maximum(pt, tt)
    area_int = w_int * h_int
    area_union = target_area + pred_area - area_int
    ac = g_w * g_h + 1e-7
    ious = (area_int + 1.0) / (area_union + 1.0)
    gious = ious - (ac - area_union) / ac
    if loc_loss_type in ("diou", "ciou"):
        tcx, tcy = (tr - tl) / 2, (tt - tb) / 2
        pcx, pcy = (pr - pl_) / 2, (pt - pb) / 2
        inter_diag = (tcx - pcx) ** 2 + (tcy - pcy) ** 2
        outer_diag = g_w ** 2 + g_h ** 2
        u = inter_diag / outer_diag
        dious = ious - u
    if loc_loss_type == "iou":
        losses = -jnp.log(ious)
    elif loc_loss_type == "liou":
        losses = 1 - ious
    elif loc_loss_type == "giou":
        losses = 1 - gious
    elif loc_loss_type == "diou":
        losses = 1 - dious
    elif loc_loss_type == "ciou":
        v = 4 / math.pi ** 2 * jnp.square(
            jnp.arctan((tl + tr) / (tt + tb + 1e-7))
            - jnp.arctan((pl_ + pr) / (pt + pb + 1e-7)))
        S = 1 - ious
        alpha = v / (S + v)
        cious = ious - (u + alpha * v)
        losses = 1 - cious
    else:
        raise NotImplementedError
    if weight is not None and weight.sum() > 0:
        return (losses * weight).sum()
    return losses.sum()


if __name__ == "__main__":
    key = jax.random.PRNGKey(0)
    k1, k2, k3 = jax.random.split(key, 3)
    failures = []

    def check(got, want, msg):
        got = jax.block_until_ready(got)
        if not jnp.allclose(got, want, rtol=1e-3, atol=1e-2):
            failures.append(f"{msg}: got {got} want {want}")

    # Case 1: module-native [N, 4] layout (fallback repack path), tiny N,
    # single-step grid with in-kernel validity masking.
    n1 = 37
    pred1 = jax.random.uniform(k1, (n1, 4), jnp.float32, minval=0.1, maxval=8.0)
    tgt1 = jax.random.uniform(k2, (n1, 4), jnp.float32, minval=0.1, maxval=8.0)
    w1 = jax.random.uniform(k3, (n1,), jnp.float32)
    for lt in ("iou", "liou", "giou", "diou", "ciou"):
        for w in (None, w1):
            got = iou_loss(pred1, tgt1, w, loc_loss_type=lt)
            want = iou_loss_ref(pred1, tgt1, w, lt)
            check(got, want, f"case1 {lt} weighted={w is not None}")

    # Case 2: planar (4, R, 128) bf16 boxes (zero-copy path, in-kernel upcast),
    # multi-step grid.
    n2 = 3000
    r2 = pl.cdiv(n2, LANES)
    pred2 = jax.random.uniform(k1, (4, r2, LANES), jnp.float32, 0.1, 8.0).astype(jnp.bfloat16)
    tgt2 = jax.random.uniform(k2, (4, r2, LANES), jnp.float32, 0.1, 8.0).astype(jnp.bfloat16)
    w2 = jax.random.uniform(k3, (n2,), jnp.float32)
    pred2_n4 = pred2.astype(jnp.float32).reshape(4, -1).T[:n2]
    tgt2_n4 = tgt2.astype(jnp.float32).reshape(4, -1).T[:n2]
    for lt in ("giou", "ciou"):
        for w in (None, w2):
            got = iou_loss(pred2, tgt2, w, loc_loss_type=lt, num_boxes=n2)
            want = iou_loss_ref(pred2_n4, tgt2_n4, w, lt)
            check(got, want, f"case2 {lt} weighted={w is not None}")

    # Case 3: larger planar f32 input -> 4-step grid with a bigger tile.
    n3 = 65519
    r3 = pl.cdiv(n3, LANES)
    pred3 = jax.random.uniform(k1, (4, r3, LANES), jnp.float32, 0.1, 8.0)
    tgt3 = jax.random.uniform(k2, (4, r3, LANES), jnp.float32, 0.1, 8.0)
    w3 = jax.random.uniform(k3, (n3,), jnp.float32)
    pred3_n4 = pred3.reshape(4, -1).T[:n3]
    tgt3_n4 = tgt3.reshape(4, -1).T[:n3]
    for w in (None, w3):
        got = iou_loss(pred3, tgt3, w, loc_loss_type="giou", num_boxes=n3)
        want = iou_loss_ref(pred3_n4, tgt3_n4, w, "giou")
        check(got, want, f"case3 giou weighted={w is not None}")

    if failures:
        for f in failures:
            print("MISMATCH", f)
    else:
        print("KERNEL_OK")
</pallas_src>

<mosaic_0001>
module attributes {stable_mosaic.version = 11 : i64} {
  func.func @kernel(%arg0: i32, %arg1: memref<4x8x128xf32, #tpu.memory_space<vmem>>, %arg2: memref<4x8x128xf32, #tpu.memory_space<vmem>>, %arg3: memref<1x8x128xf32, #tpu.memory_space<vmem>>) attributes {dimension_semantics = [#tpu.dimension_semantics<parallel>], iteration_bounds = array<i64: 1>, scalar_prefetch = 0 : i64, scratch_operands = 0 : i64, tpu.core_type = #tpu.core_type<tc>, window_params = [{transform_indices = @transform_0, window_bounds = array<i64: 4, 8, 128>}, {transform_indices = @transform_1, window_bounds = array<i64: 4, 8, 128>}, {transform_indices = @transform_2, window_bounds = array<i64: 1, 8, 128>}]} {
    %c0 = arith.constant 0 : index
    %c0_0 = arith.constant 0 : index
    %c0_1 = arith.constant 0 : index
    %0 = vector.load %arg1[%c0, %c0_0, %c0_1] : memref<4x8x128xf32, #tpu.memory_space<vmem>>, vector<1x8x128xf32>
    %1 = vector.shape_cast %0 : vector<1x8x128xf32> to vector<8x128xf32>
    %c1 = arith.constant 1 : index
    %c0_2 = arith.constant 0 : index
    %c0_3 = arith.constant 0 : index
    %2 = vector.load %arg1[%c1, %c0_2, %c0_3] : memref<4x8x128xf32, #tpu.memory_space<vmem>>, vector<1x8x128xf32>
    %3 = vector.shape_cast %2 : vector<1x8x128xf32> to vector<8x128xf32>
    %c2 = arith.constant 2 : index
    %c0_4 = arith.constant 0 : index
    %c0_5 = arith.constant 0 : index
    %4 = vector.load %arg1[%c2, %c0_4, %c0_5] : memref<4x8x128xf32, #tpu.memory_space<vmem>>, vector<1x8x128xf32>
    %5 = vector.shape_cast %4 : vector<1x8x128xf32> to vector<8x128xf32>
    %c3 = arith.constant 3 : index
    %c0_6 = arith.constant 0 : index
    %c0_7 = arith.constant 0 : index
    %6 = vector.load %arg1[%c3, %c0_6, %c0_7] : memref<4x8x128xf32, #tpu.memory_space<vmem>>, vector<1x8x128xf32>
    %7 = vector.shape_cast %6 : vector<1x8x128xf32> to vector<8x128xf32>
    %c0_8 = arith.constant 0 : index
    %c0_9 = arith.constant 0 : index
    %c0_10 = arith.constant 0 : index
    %8 = vector.load %arg2[%c0_8, %c0_9, %c0_10] : memref<4x8x128xf32, #tpu.memory_space<vmem>>, vector<1x8x128xf32>
    %9 = vector.shape_cast %8 : vector<1x8x128xf32> to vector<8x128xf32>
    %c1_11 = arith.constant 1 : index
    %c0_12 = arith.constant 0 : index
    %c0_13 = arith.constant 0 : index
    %10 = vector.load %arg2[%c1_11, %c0_12, %c0_13] : memref<4x8x128xf32, #tpu.memory_space<vmem>>, vector<1x8x128xf32>
    %11 = vector.shape_cast %10 : vector<1x8x128xf32> to vector<8x128xf32>
    %c2_14 = arith.constant 2 : index
    %c0_15 = arith.constant 0 : index
    %c0_16 = arith.constant 0 : index
    %12 = vector.load %arg2[%c2_14, %c0_15, %c0_16] : memref<4x8x128xf32, #tpu.memory_space<vmem>>, vector<1x8x128xf32>
    %13 = vector.shape_cast %12 : vector<1x8x128xf32> to vector<8x128xf32>
    %c3_17 = arith.constant 3 : index
    %c0_18 = arith.constant 0 : index
    %c0_19 = arith.constant 0 : index
    %14 = vector.load %arg2[%c3_17, %c0_18, %c0_19] : memref<4x8x128xf32, #tpu.memory_space<vmem>>, vector<1x8x128xf32>
    %15 = vector.shape_cast %14 : vector<1x8x128xf32> to vector<8x128xf32>
    %16 = arith.addf %9, %13 : vector<8x128xf32>
    %17 = arith.addf %11, %15 : vector<8x128xf32>
    %18 = arith.mulf %16, %17 : vector<8x128xf32>
    %19 = arith.addf %1, %5 : vector<8x128xf32>
    %20 = arith.addf %3, %7 : vector<8x128xf32>
    %21 = arith.mulf %19, %20 : vector<8x128xf32>
    %22 = arith.minimumf %1, %9 : vector<8x128xf32>
    %23 = arith.minimumf %5, %13 : vector<8x128xf32>
    %24 = arith.addf %22, %23 : vector<8x128xf32>
    %25 = arith.minimumf %7, %15 : vector<8x128xf32>
    %26 = arith.minimumf %3, %11 : vector<8x128xf32>
    %27 = arith.addf %25, %26 : vector<8x128xf32>
    %28 = arith.mulf %24, %27 : vector<8x128xf32>
    %29 = arith.addf %18, %21 : vector<8x128xf32>
    %30 = arith.subf %29, %28 : vector<8x128xf32>
    %cst = arith.constant 1.000000e+00 : f32
    %31 = vector.broadcast %cst : f32 to vector<8x128xf32>
    %32 = arith.addf %28, %31 : vector<8x128xf32>
    %cst_20 = arith.constant 1.000000e+00 : f32
    %33 = vector.broadcast %cst_20 : f32 to vector<8x128xf32>
    %34 = arith.addf %30, %33 : vector<8x128xf32>
    %35 = arith.divf %32, %34 : vector<8x128xf32>
    %36 = math.log %35 : vector<8x128xf32>
    %cst_21 = arith.constant 0.000000e+00 : f32
    %37 = vector.broadcast %cst_21 : f32 to vector<8x128xf32>
    %38 = arith.subf %37, %36 : vector<8x128xf32>
    %39 = tpu.iota {dimensions = array<i32: 0>} : vector<8x128xi32>
    %40 = tpu.iota {dimensions = array<i32: 1>} : vector<8x128xi32>
    %c8_i32 = arith.constant 8 : i32
    %41 = arith.muli %arg0, %c8_i32 : i32
    %42 = vector.broadcast %41 : i32 to vector<8x128xi32>
    %43 = arith.addi %42, %39 : vector<8x128xi32>
    %c128_i32 = arith.constant 128 : i32
    %44 = vector.broadcast %c128_i32 : i32 to vector<8x128xi32>
    %45 = arith.muli %43, %44 : vector<8x128xi32>
    %46 = arith.addi %45, %40 : vector<8x128xi32>
    %c37_i32 = arith.constant 37 : i32
    %47 = vector.broadcast %c37_i32 : i32 to vector<8x128xi32>
    %48 = arith.cmpi slt, %46, %47 : vector<8x128xi32>
    %cst_22 = arith.constant 0.000000e+00 : f32
    %49 = vector.broadcast %cst_22 : f32 to vector<8x128xf32>
    %50 = arith.select %48, %38, %49 : vector<8x128xi1>, vector<8x128xf32>
    %51 = vector.shape_cast %50 : vector<8x128xf32> to vector<1x8x128xf32>
    %cst_23 = arith.constant dense<0.000000e+00> : vector<8x128xf32>
    %52 = vector.multi_reduction <add>, %51, %cst_23 [0] : vector<1x8x128xf32> to vector<8x128xf32>
    %53 = vector.shape_cast %52 : vector<8x128xf32> to vector<1x8x128xf32>
    %c0_24 = arith.constant 0 : index
    %c0_25 = arith.constant 0 : index
    %c0_26 = arith.constant 0 : index
    %54 = vector.load %arg3[%c0_24, %c0_25, %c0_26] : memref<1x8x128xf32, #tpu.memory_space<vmem>>, vector<1x8x128xf32>
    tpu.vector_store %arg3[%c0_24, %c0_25, %c0_26], %53 {strides = array<i32>} : memref<1x8x128xf32, #tpu.memory_space<vmem>>, vector<1x8x128xf32>,
    return
  }
  func.func @transform_0(%arg0: i32) -> (i32, i32, i32) {
    %c0_i32 = arith.constant 0 : i32
    %c0_i32_0 = arith.constant 0 : i32
    %c0_i32_1 = arith.constant 0 : i32
    return %c0_i32, %arg0, %c0_i32_0 : i32, i32, i32
  }
  func.func @transform_1(%arg0: i32) -> (i32, i32, i32) {
    %c0_i32 = arith.constant 0 : i32
    %c0_i32_0 = arith.constant 0 : i32
    %c0_i32_1 = arith.constant 0 : i32
    return %c0_i32, %arg0, %c0_i32_0 : i32, i32, i32
  }
  func.func @transform_2(%arg0: i32) -> (i32, i32, i32) {
    %c0_i32 = arith.constant 0 : i32
    %c0_i32_0 = arith.constant 0 : i32
    %c0_i32_1 = arith.constant 0 : i32
    return %arg0, %c0_i32, %c0_i32_0 : i32, i32, i32
  }
}

</mosaic_0001>

<bundles_post_ra>
// kernel: iou_loss.1
= control target key start
LH: loop header
LB: loop body
LE: loop exit
PB: predicated region body
PF: predicated region fallthrough
CT: control target
= control target key end

     0   :  { %v60_v30 = vlaneseq  ;;  %s129_s0 = inlined_call_operand.vmem [shape: f32[4,8,128], index: 0, kind: input, shape index: {}]   ;;  %s130_s1 = inlined_call_operand.vmem [shape: f32[4,8,128], index: 1, kind: input, shape index: {}]   ;;  %s131_s2 = inlined_call_operand.vmem [shape: f32[1,8,128], index: 2, kind: output, shape index: {}]  }
   0x1   :  { %v11_v0 = vld [vmem:[%s129_s0] sm:$0xff]  ;;  %v77_v1 = vld [vmem:[%s129_s0 + $0x8] sm:$0xff]  ;;  %v78_v2 = vld [vmem:[%s129_s0 + $0x10] sm:$0xff] }
   0x2   :  { %v79_v3 = vld [vmem:[%s129_s0 + $0x18] sm:$0xff]  ;;  %v18_v4 = vld [vmem:[%s130_s1] sm:$0xff]  ;;  %v80_v5 = vld [vmem:[%s130_s1 + $0x8] sm:$0xff]  ;;  %v28_v6 = vadd.f32 %v78_v2, %v11_v0  ;;  %v61_v35 = vshrl.u32 %v60_v30, 7  ;;  %v63_v38 = vand.u32 127, %v60_v30 }
   0x3   :  { %v81_v7 = vld [vmem:[%s130_s1 + $0x10] sm:$0xff]  ;;  %v82_v8 = vld [vmem:[%s130_s1 + $0x18] sm:$0xff]  ;;  %v29_v9 = vadd.f32 %v79_v3, %v77_v1  ;;  %v31_v10 = vmin.f32 %v11_v0, %v18_v4  ;;  %v35_v11 = vmin.f32 %v77_v1, %v80_v5 }
   0x4   :  { %v25_v12 = vadd.f32 %v81_v7, %v18_v4  ;;  %v26_v13 = vadd.f32 %v82_v8, %v80_v5  ;;  %v32_v14 = vmin.f32 %v78_v2, %v81_v7  ;;  %v34_v15 = vmin.f32 %v79_v3, %v82_v8 }
   0x5   :  { %v30_v16 = vmul.f32 %v29_v9, %v28_v6  ;;  %v67_v39 = vmul.u32 128, %v61_v35 }
   0x6   :  { %v27_v17 = vmul.f32 %v26_v13, %v25_v12  ;;  %v33_v18 = vadd.f32 %v32_v14, %v31_v10  ;;  %v36_v19 = vadd.f32 %v35_v11, %v34_v15 }
   0x7   :  { %v68_v40 = vadd.s32 %v67_v39, %v63_v38 }
   0x8   :  { %v37_v20 = vmul.f32 %v36_v19, %v33_v18  ;;  %v38_v21 = vadd.f32 %v30_v16, %v27_v17 }
   0x9   :  { %vm69_vm4 = vcmp.lt.s32.totalorder %v68_v40, 37 }
   0xa   :  { %v39_v22 = vsub.f32 %v38_v21, %v37_v20  ;;  %v40_v32 = vadd.f32 1.0, %v37_v20 }
   0xc   :  { %v41_v23 = vadd.f32 1.0, %v39_v22 }
   0xe   :  { %83 = vrcp.f32 %v41_v23  ;;  %v53_v26 = vand.u32 2147483648, %v41_v23  ;;  %vm47_vm0 = vweird.f32 %v41_v23  ;;  %v51_v28 = vand.u32 2147483647, %v41_v23 }
  0x10   :  { %v54_v31 = vor.u32 1.1754944e-38, %v53_v26  ;;  %vm52_vm3 = vcmp.eq.f32.partialorder %v51_v28, 8.507059e+37 }
  0x14   :  { %v84_v24 = vpop.eup %83 }
  0x15   :  { %v43_v25 = vmul.f32 %v84_v24, %v41_v23  ;;  %vm48_vm1 = vweird.f32 %v84_v24 }
  0x16   :  { %vm49_vm2 = vmor %vm47_vm0, %vm48_vm1 }
  0x17   :  { %v44_v27 = vsub.f32 1.0, %v43_v25 }
  0x19   :  { %v45_v29 = vmul.f32 %v84_v24, %v44_v27 }
  0x1b   :  { %v46_v33 = vadd.f32 %v84_v24, %v45_v29 }
  0x1d   :  { %v50_v34 = vsel %vm49_vm2, %v84_v24, %v46_v33 }
  0x1e   :  { %v55_v36 = vsel %vm52_vm3, %v54_v31, %v50_v34 }
  0x1f   :  { %v56_v37 = vmul.f32 %v55_v36, %v40_v32 }
  0x21   :  { %85 = vlog2.f32 %v56_v37 }
  0x27   :  { %v86_v41 = vpop.eup %85 }
  0x28   :  { %v58_v42 = vmul.f32 0.6931472, %v86_v41 }
  0x2a   :  { %v59_v43 = vsub.f32 0.0, %v58_v42 }
  0x2c   :  { %v70_v44 = vsel %vm69_vm4, %v59_v43, 0.0 }
  0x2d   :  { %72 = vst [vmem:[%s131_s2] sm:$0xff] %v70_v44 }

</bundles_post_ra>
